<compile_context>
chip_gen: v7x
topology: tpu7x:2x2x1
jax: 0.10.0
libtpu: 0.0.40
codegen_flags: <defaults>
</compile_context>

<pallas_src>
import functools

import jax
import jax.numpy as jnp
from jax.experimental import pallas as pl
from jax.experimental.pallas import tpu as pltpu

_LANE = 128


def _outconv_kernel(x_ref, w_ref, b_ref, o_ref):
    # x_ref: (C_in, TM)  VMEM   (channel-major, lane-dense)
    # w_ref: (C_out, C_in) SMEM (scalars)
    # b_ref: (C_out,)      SMEM (scalars)
    # o_ref: (C_out, TM) VMEM
    c_in, tm = x_ref.shape
    c_out = o_ref.shape[0]

    x = x_ref[...].astype(jnp.float32)  # single lane-dense load of (C_in, TM)

    # Tiny channel counts: unrolled VPU broadcast-FMAs, no MXU.
    for co in range(c_out):
        acc = jnp.full((1, tm), b_ref[co], dtype=jnp.float32)
        for ci in range(c_in):
            acc = acc + w_ref[co, ci] * x[ci:ci + 1, :]
        o_ref[pl.ds(co, 1), :] = acc.astype(o_ref.dtype)


def outconv_pallas(x_nchw, weight, bias, *, tile_m=2048):
    """1x1 Conv2d forward (PyTorch OutConv semantics).

    x_nchw : (N, C_in, H, W)      float32
    weight : (C_out, C_in, 1, 1)  float32  (PyTorch Conv2d layout)
    bias   : (C_out,)             float32
    returns (N, C_out, H, W)      float32
    """
    N, C_in, H, W = x_nchw.shape
    C_out = weight.shape[0]
    M = H * W

    # --- lane-dense channel-major layout: free reshape of NCHW ------------
    x_mat = x_nchw.reshape(N, C_in, M)
    w_mat = weight.reshape(C_out, C_in)   # small -> SMEM scalars
    b_vec = bias.reshape(C_out)

    # --- tile selection + padding of the lane (spatial) axis ---------------
    # Last block dim must be a multiple of 128; pad M and slice afterwards.
    tile = max(_LANE, min(int(tile_m), pl.cdiv(M, _LANE) * _LANE))
    tile = pl.cdiv(tile, _LANE) * _LANE
    M_pad = pl.cdiv(M, tile) * tile
    if M_pad != M:
        x_mat = jnp.pad(x_mat, ((0, 0), (0, 0), (0, M_pad - M)))

    grid = (N, M_pad // tile)  # >= 2 iterations whenever N >= 2 (v7x megacore)

    cost = pl.CostEstimate(
        flops=2 * N * M * C_in * C_out,
        transcendentals=0,
        bytes_accessed=4 * (N * M_pad * C_in + N * M_pad * C_out
                            + C_out * C_in + C_out),
    )

    out_mat = pl.pallas_call(
        _outconv_kernel,
        out_shape=jax.ShapeDtypeStruct((N, C_out, M_pad), x_mat.dtype),
        grid_spec=pltpu.PrefetchScalarGridSpec(
            num_scalar_prefetch=0,
            grid=grid,
            in_specs=[
                # batch dim squeezed out; kernel sees (C_in, tile)
                pl.BlockSpec((None, C_in, tile), lambda n, m: (n, 0, m)),
                # tiny weight / bias live entirely in SMEM as scalars
                pl.BlockSpec(memory_space=pltpu.MemorySpace.SMEM),
                pl.BlockSpec(memory_space=pltpu.MemorySpace.SMEM),
            ],
            out_specs=pl.BlockSpec((None, C_out, tile), lambda n, m: (n, 0, m)),
        ),
        compiler_params=pltpu.CompilerParams(
            dimension_semantics=("parallel", "parallel"),
        ),
        cost_estimate=cost,
    )(x_mat, w_mat, b_vec)

    # Free reshape back to NCHW (slice off lane padding first).
    return out_mat[:, :, :M].reshape(N, C_out, H, W)


if __name__ == "__main__":
    # Deterministic parameters / inputs (synthetic, no checkpoint load).
    key = jax.random.PRNGKey(0)
    k_x, k_w, k_b = jax.random.split(key, 3)

    N, C_in, C_out, H, W = 2, 4, 3, 16, 16

    x = jax.random.normal(k_x, (N, C_in, H, W), dtype=jnp.float32)
    weight = jax.random.normal(k_w, (C_out, C_in, 1, 1), dtype=jnp.float32) * 0.1
    bias = jax.random.normal(k_b, (C_out,), dtype=jnp.float32) * 0.1

    y = jax.block_until_ready(outconv_pallas(x, weight, bias))

    # Reference: plain-JAX 1x1 conv semantics (NCHW).
    y_ref = jnp.einsum("nchw,oc->nohw", x, weight.reshape(C_out, C_in)) \
            + bias.reshape(1, C_out, 1, 1)

    assert y.shape == (N, C_out, H, W)
    assert jnp.allclose(y, y_ref, atol=1e-5, rtol=1e-5)
    print("KERNEL_OK")
</pallas_src>

<mosaic_0001>
module attributes {stable_mosaic.version = 11 : i64} {
  func.func @_outconv_kernel(%arg0: i32, %arg1: i32, %arg2: memref<1x4x256xf32, #tpu.memory_space<vmem>>, %arg3: memref<3x4xf32, #tpu.memory_space<smem>>, %arg4: memref<3xf32, #tpu.memory_space<smem>>, %arg5: memref<1x3x256xf32, #tpu.memory_space<vmem>>) attributes {dimension_semantics = [#tpu.dimension_semantics<parallel>, #tpu.dimension_semantics<parallel>], iteration_bounds = array<i64: 2, 1>, scalar_prefetch = 0 : i64, scratch_operands = 0 : i64, tpu.core_type = #tpu.core_type<tc>, window_params = [{transform_indices = @transform_0, window_bounds = array<i64: 1, 4, 256>}, {transform_indices = @transform_1, window_bounds = array<i64: 3, 4>}, {transform_indices = @transform_2, window_bounds = array<i64: 3>}, {transform_indices = @transform_3, window_bounds = array<i64: 1, 3, 256>}]} {
    %c0 = arith.constant 0 : index
    %c0_0 = arith.constant 0 : index
    %c0_1 = arith.constant 0 : index
    %0 = vector.load %arg2[%c0, %c0_0, %c0_1] : memref<1x4x256xf32, #tpu.memory_space<vmem>>, vector<1x4x256xf32>
    %1 = vector.shape_cast %0 : vector<1x4x256xf32> to vector<4x256xf32>
    %c0_2 = arith.constant 0 : index
    %2 = memref.load %arg4[%c0_2] : memref<3xf32, #tpu.memory_space<smem>>
    %3 = vector.broadcast %2 : f32 to vector<1x256xf32>
    %c0_3 = arith.constant 0 : index
    %c0_4 = arith.constant 0 : index
    %4 = memref.load %arg3[%c0_3, %c0_4] : memref<3x4xf32, #tpu.memory_space<smem>>
    %5 = vector.extract_strided_slice %1 {offsets = [0, 0], sizes = [1, 256], strides = [1, 1]} : vector<4x256xf32> to vector<1x256xf32>
    %6 = vector.broadcast %4 : f32 to vector<1x256xf32>
    %7 = arith.mulf %6, %5 : vector<1x256xf32>
    %8 = arith.addf %3, %7 : vector<1x256xf32>
    %c0_5 = arith.constant 0 : index
    %c1 = arith.constant 1 : index
    %9 = memref.load %arg3[%c0_5, %c1] : memref<3x4xf32, #tpu.memory_space<smem>>
    %10 = vector.extract_strided_slice %1 {offsets = [1, 0], sizes = [1, 256], strides = [1, 1]} : vector<4x256xf32> to vector<1x256xf32>
    %11 = vector.broadcast %9 : f32 to vector<1x256xf32>
    %12 = arith.mulf %11, %10 : vector<1x256xf32>
    %13 = arith.addf %8, %12 : vector<1x256xf32>
    %c0_6 = arith.constant 0 : index
    %c2 = arith.constant 2 : index
    %14 = memref.load %arg3[%c0_6, %c2] : memref<3x4xf32, #tpu.memory_space<smem>>
    %15 = vector.extract_strided_slice %1 {offsets = [2, 0], sizes = [1, 256], strides = [1, 1]} : vector<4x256xf32> to vector<1x256xf32>
    %16 = vector.broadcast %14 : f32 to vector<1x256xf32>
    %17 = arith.mulf %16, %15 : vector<1x256xf32>
    %18 = arith.addf %13, %17 : vector<1x256xf32>
    %c0_7 = arith.constant 0 : index
    %c3 = arith.constant 3 : index
    %19 = memref.load %arg3[%c0_7, %c3] : memref<3x4xf32, #tpu.memory_space<smem>>
    %20 = vector.extract_strided_slice %1 {offsets = [3, 0], sizes = [1, 256], strides = [1, 1]} : vector<4x256xf32> to vector<1x256xf32>
    %21 = vector.broadcast %19 : f32 to vector<1x256xf32>
    %22 = arith.mulf %21, %20 : vector<1x256xf32>
    %23 = arith.addf %18, %22 : vector<1x256xf32>
    %c0_8 = arith.constant 0 : index
    %c0_9 = arith.constant 0 : index
    %c0_10 = arith.constant 0 : index
    %24 = vector.load %arg5[%c0_8, %c0_9, %c0_10] : memref<1x3x256xf32, #tpu.memory_space<vmem>>, vector<1x1x256xf32>
    %25 = vector.shape_cast %24 : vector<1x1x256xf32> to vector<1x256xf32>
    %26 = vector.shape_cast %23 : vector<1x256xf32> to vector<1x1x256xf32>
    tpu.vector_store %arg5[%c0_8, %c0_9, %c0_10], %26 {strides = array<i32>} : memref<1x3x256xf32, #tpu.memory_space<vmem>>, vector<1x1x256xf32>,
    %c1_11 = arith.constant 1 : index
    %27 = memref.load %arg4[%c1_11] : memref<3xf32, #tpu.memory_space<smem>>
    %28 = vector.broadcast %27 : f32 to vector<1x256xf32>
    %c1_12 = arith.constant 1 : index
    %c0_13 = arith.constant 0 : index
    %29 = memref.load %arg3[%c1_12, %c0_13] : memref<3x4xf32, #tpu.memory_space<smem>>
    %30 = vector.extract_strided_slice %1 {offsets = [0, 0], sizes = [1, 256], strides = [1, 1]} : vector<4x256xf32> to vector<1x256xf32>
    %31 = vector.broadcast %29 : f32 to vector<1x256xf32>
    %32 = arith.mulf %31, %30 : vector<1x256xf32>
    %33 = arith.addf %28, %32 : vector<1x256xf32>
    %c1_14 = arith.constant 1 : index
    %c1_15 = arith.constant 1 : index
    %34 = memref.load %arg3[%c1_14, %c1_15] : memref<3x4xf32, #tpu.memory_space<smem>>
    %35 = vector.extract_strided_slice %1 {offsets = [1, 0], sizes = [1, 256], strides = [1, 1]} : vector<4x256xf32> to vector<1x256xf32>
    %36 = vector.broadcast %34 : f32 to vector<1x256xf32>
    %37 = arith.mulf %36, %35 : vector<1x256xf32>
    %38 = arith.addf %33, %37 : vector<1x256xf32>
    %c1_16 = arith.constant 1 : index
    %c2_17 = arith.constant 2 : index
    %39 = memref.load %arg3[%c1_16, %c2_17] : memref<3x4xf32, #tpu.memory_space<smem>>
    %40 = vector.extract_strided_slice %1 {offsets = [2, 0], sizes = [1, 256], strides = [1, 1]} : vector<4x256xf32> to vector<1x256xf32>
    %41 = vector.broadcast %39 : f32 to vector<1x256xf32>
    %42 = arith.mulf %41, %40 : vector<1x256xf32>
    %43 = arith.addf %38, %42 : vector<1x256xf32>
    %c1_18 = arith.constant 1 : index
    %c3_19 = arith.constant 3 : index
    %44 = memref.load %arg3[%c1_18, %c3_19] : memref<3x4xf32, #tpu.memory_space<smem>>
    %45 = vector.extract_strided_slice %1 {offsets = [3, 0], sizes = [1, 256], strides = [1, 1]} : vector<4x256xf32> to vector<1x256xf32>
    %46 = vector.broadcast %44 : f32 to vector<1x256xf32>
    %47 = arith.mulf %46, %45 : vector<1x256xf32>
    %48 = arith.addf %43, %47 : vector<1x256xf32>
    %c0_20 = arith.constant 0 : index
    %c1_21 = arith.constant 1 : index
    %c0_22 = arith.constant 0 : index
    %49 = vector.load %arg5[%c0_20, %c1_21, %c0_22] : memref<1x3x256xf32, #tpu.memory_space<vmem>>, vector<1x1x256xf32>
    %50 = vector.shape_cast %49 : vector<1x1x256xf32> to vector<1x256xf32>
    %51 = vector.shape_cast %48 : vector<1x256xf32> to vector<1x1x256xf32>
    tpu.vector_store %arg5[%c0_20, %c1_21, %c0_22], %51 {strides = array<i32>} : memref<1x3x256xf32, #tpu.memory_space<vmem>>, vector<1x1x256xf32>,
    %c2_23 = arith.constant 2 : index
    %52 = memref.load %arg4[%c2_23] : memref<3xf32, #tpu.memory_space<smem>>
    %53 = vector.broadcast %52 : f32 to vector<1x256xf32>
    %c2_24 = arith.constant 2 : index
    %c0_25 = arith.constant 0 : index
    %54 = memref.load %arg3[%c2_24, %c0_25] : memref<3x4xf32, #tpu.memory_space<smem>>
    %55 = vector.extract_strided_slice %1 {offsets = [0, 0], sizes = [1, 256], strides = [1, 1]} : vector<4x256xf32> to vector<1x256xf32>
    %56 = vector.broadcast %54 : f32 to vector<1x256xf32>
    %57 = arith.mulf %56, %55 : vector<1x256xf32>
    %58 = arith.addf %53, %57 : vector<1x256xf32>
    %c2_26 = arith.constant 2 : index
    %c1_27 = arith.constant 1 : index
    %59 = memref.load %arg3[%c2_26, %c1_27] : memref<3x4xf32, #tpu.memory_space<smem>>
    %60 = vector.extract_strided_slice %1 {offsets = [1, 0], sizes = [1, 256], strides = [1, 1]} : vector<4x256xf32> to vector<1x256xf32>
    %61 = vector.broadcast %59 : f32 to vector<1x256xf32>
    %62 = arith.mulf %61, %60 : vector<1x256xf32>
    %63 = arith.addf %58, %62 : vector<1x256xf32>
    %c2_28 = arith.constant 2 : index
    %c2_29 = arith.constant 2 : index
    %64 = memref.load %arg3[%c2_28, %c2_29] : memref<3x4xf32, #tpu.memory_space<smem>>
    %65 = vector.extract_strided_slice %1 {offsets = [2, 0], sizes = [1, 256], strides = [1, 1]} : vector<4x256xf32> to vector<1x256xf32>
    %66 = vector.broadcast %64 : f32 to vector<1x256xf32>
    %67 = arith.mulf %66, %65 : vector<1x256xf32>
    %68 = arith.addf %63, %67 : vector<1x256xf32>
    %c2_30 = arith.constant 2 : index
    %c3_31 = arith.constant 3 : index
    %69 = memref.load %arg3[%c2_30, %c3_31] : memref<3x4xf32, #tpu.memory_space<smem>>
    %70 = vector.extract_strided_slice %1 {offsets = [3, 0], sizes = [1, 256], strides = [1, 1]} : vector<4x256xf32> to vector<1x256xf32>
    %71 = vector.broadcast %69 : f32 to vector<1x256xf32>
    %72 = arith.mulf %71, %70 : vector<1x256xf32>
    %73 = arith.addf %68, %72 : vector<1x256xf32>
    %c0_32 = arith.constant 0 : index
    %c2_33 = arith.constant 2 : index
    %c0_34 = arith.constant 0 : index
    %74 = vector.load %arg5[%c0_32, %c2_33, %c0_34] : memref<1x3x256xf32, #tpu.memory_space<vmem>>, vector<1x1x256xf32>
    %75 = vector.shape_cast %74 : vector<1x1x256xf32> to vector<1x256xf32>
    %76 = vector.shape_cast %73 : vector<1x256xf32> to vector<1x1x256xf32>
    tpu.vector_store %arg5[%c0_32, %c2_33, %c0_34], %76 {strides = array<i32>} : memref<1x3x256xf32, #tpu.memory_space<vmem>>, vector<1x1x256xf32>,
    return
  }
  func.func @transform_0(%arg0: i32, %arg1: i32) -> (i32, i32, i32) {
    %c0_i32 = arith.constant 0 : i32
    %c0_i32_0 = arith.constant 0 : i32
    return %arg0, %c0_i32, %arg1 : i32, i32, i32
  }
  func.func @transform_1(%arg0: i32, %arg1: i32) -> (i32, i32) {
    %c0_i32 = arith.constant 0 : i32
    %c0_i32_0 = arith.constant 0 : i32
    %c0_i32_1 = arith.constant 0 : i32
    return %c0_i32, %c0_i32_0 : i32, i32
  }
  func.func @transform_2(%arg0: i32, %arg1: i32) -> i32 {
    %c0_i32 = arith.constant 0 : i32
    %c0_i32_0 = arith.constant 0 : i32
    return %c0_i32 : i32
  }
  func.func @transform_3(%arg0: i32, %arg1: i32) -> (i32, i32, i32) {
    %c0_i32 = arith.constant 0 : i32
    %c0_i32_0 = arith.constant 0 : i32
    return %arg0, %c0_i32, %arg1 : i32, i32, i32
  }
}

</mosaic_0001>

<bundles_post_ra>
// kernel: tpu_custom_call.1
= control target key start
LH: loop header
LB: loop body
LE: loop exit
PB: predicated region body
PF: predicated region fallthrough
CT: control target
= control target key end

     0   :  { %8 = vsyncpa [#allocation3], 0  ;;  %s982_s0 = inlined_call_operand.hbm [shape: f32[2,4,256], index: 0, kind: input, shape index: {}]   ;;  %s983_s1 = inlined_call_operand.hbm [shape: f32[3,4], index: 1, kind: input, shape index: {}]   ;;  %s984_s2 = inlined_call_operand.vmem [shape: f32[3], index: 2, kind: input, shape index: {}]   ;;  %s985_s3 = inlined_call_operand.vmem [shape: f32[2,3,256], index: 3, kind: output, shape index: {}]  }
   0x1   :  { %10 = vsyncpa [#allocation3 + $0x1], 0 }
   0x2   :  { %11 = vsyncpa [#allocation4], 0 }
   0x3   :  { %12 = vsyncpa [#allocation5], 0  ;;  %s771_s12 = smov 0   ;;  %s773_s13 = smov 0  }
   0x4   :  { %s775_s14 = smov 0   ;;  %s777_s15 = smov 0  }
   0x5   :  { %s779_s16 = smov 0   ;;  %s781_s17 = smov 0  }
   0x6 LB: > { %s509_s18 = sadd.s32 4294967295, %s745_s17   ;;  %p52_p0 = scmp.ne.s32.totalorder %s729_s13, %s725_s12  ;;  %s745_s17 = sphi %s781_s17, %s18_s17   ;;  %s741_s16 = sphi %s779_s16, %s1003_s16   ;;  %s737_s15 = sphi %s777_s15, %s1002_s15   ;;  %s733_s14 = sphi %s775_s14, %s1001_s14   ;;  %s729_s13 = sphi %s773_s13, %s1000_s13   ;;  %s725_s12 = sphi %s771_s12, %s999_s12  }
   0x7   : > { %p801_p1 = scmp.eq.s32.totalorder %s509_s18, 0  ;;  %p511_p2 = scmp.ge.s32.totalorder %s745_s17, 1 }
   0x8   : > { %p133_p3 = scmp.lt.s32.totalorder %s745_s17, 3  ;;  %s155_s24 = sshll.u32 %s984_s2, 4  ;;  %s156_s24 = int_to_ptr.vmem [resolvable:$true] %s155_s24 }
   0x9   : > { %s989_s19 = scalar_select %p801_p1, 1, 0 }
   0xa   : > { %p809_p4 = por %p801_p1, %p52_p0  ;;  %p813_p5 = pnand %p511_p2, %p133_p3 }
   0xb   : > { %s30_s26 = sadd.s32 1, %s741_s16  ;;  %s629_s30 = scalar_lea.hbm %s983_s1, 64 }
   0xc   : > { %s990_s20 = scalar_select %p809_p4, 1, 0 }
   0xd   : > { %p562_p6 = pneg %p813_p5  ;;  %p829_p8 = scmp.ge.s32.totalorder %s30_s26, 2 }
   0xe   : > { %p630_p9 = scmp.ne.s32.totalorder %s983_s1, %s629_s30  ;;  %p636_p13 = scmp.lt.u32.totalorder %s629_s30, %s983_s1 }
   0xf   : > { %p824_p7 = pnand %p562_p6, %p801_p1 }
  0x11   : > { %p631_p10 = pneg %p824_p7 }
  0x13   : > { %p632_p11 = pnand %p631_p10, %p630_p9 }
  0x15   : > { %p633_p12 = pneg %p632_p11 }
  0x17   : > { %p638_p0 = pnand %p636_p13, %p633_p12 }
  0x19   : > { %641 = shalt.err (!%p638_p0)
}
  0x1a   : > { %s747_s8 = smov [#allocation6]   ;;  %s642_s11 = scalar_lea.vmem %s156_s24, 16 }
  0x1b   : > { %565 = dma.hbm_to_smem (!%p824_p7), %s983_s1, 64, %s747_s8, [#allocation4]  }
  0x1c   : > { %p643_p2 = scmp.ne.s32.totalorder %s156_s24, %s642_s11  ;;  %p650_p1 = scmp.lt.s32.totalorder %s156_s24, %s156_s24 }
  0x1d   : > { %p651_p9 = scmp.lt.s32.totalorder %s642_s11, %s642_s11 }
  0x1e   : > { %p645_p3 = pnand %p643_p2, %p631_p10 }
  0x1f   : > { %p652_p11 = por %p651_p9, %p650_p1 }
  0x20   : > { %p646_p6 = pneg %p645_p3 }
  0x22   : > { %p653_p4 = pnand %p652_p11, %p646_p6 }
  0x24   : > { %656 = shalt.err (!%p653_p4)
}
  0x25   : > { %s748_s12 = smov [#allocation7]   ;;  %s1005_s26 = smov (%p829_p8, %s30_s26), 0 }
  0x26   : > { %568 = dma.vmem_to_smem (!%p824_p7), %s156_s24, 16, %s748_s12, [#allocation5]  }
  0x27   : > { %s39_s18 = sadd.s32 1, %s733_s14  ;;  %p46_p1 = scmp.ne.s32.totalorder %s733_s14, %s729_s13 }
  0x28   : > { %s34_s22 = ssub.s32 %s741_s16, %s1005_s26  ;;  %p47_p4 = scmp.eq.s32.totalorder %s745_s17, 0 }
  0x29   : > { %p37_p10 = scmp.eq.s32.totalorder %s34_s22, 0  ;;  %p575_p12 = scmp.lt.s32.totalorder %s745_s17, 2 }
  0x2a   : > { %p48_p13 = por %p47_p4, %p46_p1  ;;  %s166_s23 = sand.u32 1, %s733_s14  }
  0x2b   : > { %s864_s25 = scalar_select %p37_p10, %s733_s14, %s39_s18  }
  0x2c   : > { %s515_s28 = sshll.u32 %s166_s23, 3  ;;  %s550_s29 = sshll.u32 %s741_s16, 7 }
  0x2d   : > { %s870_s24 = scalar_lea.hbm %s982_s0, %s550_s29  ;;  %s170_s27 = scalar_lea.vmem [#allocation2], %s515_s28 }
  0x2e   : > { %s180_s5 = sshll.u32 %s170_s27, 4  ;;  %p874_p7 = pnand %p575_p12, %p48_p13  ;;  %s872_s5 = int_to_ptr.vmem [resolvable:$true] %s180_s5 }
  0x2f   : > { %s167_s7 = scalar_lea.sflag [#allocation3], %s166_s23  ;;  %s657_s8 = scalar_lea.hbm %s870_s24, 128 }
  0x30   : > { %p658_p8 = scmp.ne.s32.totalorder %s870_s24, %s657_s8  ;;  %p659_p0 = pneg %p874_p7 }
  0x31   : > { %s662_s11 = scalar_lea.hbm %s982_s0, 256  ;;  %p663_p6 = scmp.lt.u32.totalorder %s870_s24, %s982_s0 }
  0x32   : > { %p660_p2 = pnand %p659_p0, %p658_p8  ;;  %p664_p9 = scmp.lt.u32.totalorder %s662_s11, %s657_s8 }
  0x33   : > { %p666_p1 = scmp.lt.u32.totalorder %s657_s8, %s870_s24 }
  0x34   : > { %p661_p3 = pneg %p660_p2  ;;  %p665_p11 = por %p664_p9, %p663_p6 }
  0x36   : > { %p667_p4 = por %p666_p1, %p665_p11 }
  0x38   : > { %p668_p10 = pnand %p667_p4, %p661_p3 }
  0x3a   : > { %671 = shalt.err (!%p668_p10)
}
  0x3b   : > { %s672_s22 = scalar_lea.vmem %s872_s5, 128  ;;  %s749_s23 = smov [#allocation2]  }
  0x3c   : > { %p673_p12 = scmp.ne.s32.totalorder %s872_s5, %s672_s22  ;;  %s677_s28 = sshll.u32 %s749_s23, 4  ;;  %s678_s28 = int_to_ptr.vmem [resolvable:$false] %s677_s28 }
  0x3d   : > { %s679_s29 = scalar_lea.vmem %s678_s28, 256  ;;  %p680_p2 = scmp.lt.s32.totalorder %s872_s5, %s678_s28 }
  0x3e   : > { %p675_p13 = pnand %p673_p12, %p659_p0  ;;  %p681_p6 = scmp.lt.s32.totalorder %s679_s29, %s672_s22 }
  0x40   : > { %p676_p8 = pneg %p675_p13  ;;  %p682_p9 = por %p681_p6, %p680_p2 }
  0x42   : > { %p683_p11 = pnand %p682_p9, %p676_p8 }
  0x44   : > { %686 = shalt.err (!%p683_p11)
}
  0x45   : > { %572 = dma.hbm_to_vmem [thread:$0]  (!%p874_p7), %s870_s24, 128, %s872_s5, %s167_s7  }
  0x46   : > { %189 = sbr.rel (%p813_p5) target bundleno = 115 (0x73), region = 32  ;;  %s191_s30 = sand.u32 (!%p813_p5), 1, %s729_s13  }
  0x47   : > { %s519_s4 = sshll.u32 (!%p813_p5), %s191_s30, 3  ;;  %s192_s27 = scalar_lea.sflag (!%p813_p5), [#allocation3], %s191_s30 }
  0x48   : > { %s195_s8 = scalar_lea.vmem (!%p813_p5), [#allocation2], %s519_s4  ;;  %p995_p0 = scmp.ne.s32.totalorder (!%p813_p5), %s990_s20, 0 }
  0x4d   : > { %712 = dma.done.wait (%p995_p0), %s192_s27, 128  }
  0x4e   : > { %714 = vsyncadd (%p995_p0), %s192_s27, 4294967168  ;;  %p996_p3 = scmp.ne.s32.totalorder %s989_s19, 0 }
  0x50   : > { %716 = dma.done.wait (%p996_p3), [#allocation4], 64  }
  0x51   : > { %718 = vsyncadd (%p996_p3), [#allocation4], 4294967232 }
  0x52   : > { %720 = dma.done.wait (%p996_p3), [#allocation5], 16  }
  0x53   : > { %722 = vsyncadd (%p996_p3), [#allocation5], 4294967280 }
  0x54   : > { %208 = sfence }
  0x55   : > { %s243_s21 = sld [smem:[#allocation7]]  ;;  %s524_s5 = sld [smem:[#allocation6 + $0x1]]  ;;  %v277_v0 = vlaneseq  ;;  %v750_v1 = vmov 1966171168   ;;  %v242_v3 = vld [vmem:[%s195_s8] sm:$0xff] }
  0x56   : > { %s245_s24 = sld [smem:[#allocation6]]  ;;  %s526_s20 = sld [smem:[#allocation6 + $0x2]]  ;;  %v275_v2 = vunpack.c.l.s4 %v750_v1 }
  0x57   : > { %s528_s6 = sld [smem:[#allocation6 + $0x3]]  ;;  %s918_s7 = sld [smem:[#allocation7 + $0x1]]  ;;  %v278_v4 = vshrl.u32 %v277_v0, 7  ;;  %vm954_vm0 = vcmp.lt.s32.totalorder %v277_v0, 256 }
  0x58   : > { %p233_p5 = scmp.lt.s32.totalorder %s737_s15, 1  ;;  %s531_s9 = sld [smem:[#allocation6 + $0x80]]  ;;  %v276_v8 = vunpack.c.0.s8 %v275_v2 }
  0x59   : > { %s922_s10 = sld [smem:[#allocation6 + $0x81]]  ;;  %s924_s19 = sld [smem:[#allocation6 + $0x82]] }
  0x5a   : > { %s536_s11 = sld [smem:[#allocation6 + $0x83]]  ;;  %s926_s12 = sld [smem:[#allocation7 + $0x2]]  ;;  %v279_v17 = vsub.s32 %v276_v8, %v278_v4 }
  0x5b   : > { %v244_v5 = vstv %s243_s21  ;;  %v250_v7 = vstv %s524_s5  ;;  %s928_s18 = sld [smem:[#allocation6 + $0x100]]  ;;  %s930_s22 = sld [smem:[#allocation6 + $0x101]] }
  0x5c   : > { %v246_v6 = vstv %s245_s24  ;;  %v251_v10 = vmul.f32 %v250_v7, %v242_v3  ;;  %v258_v11 = vstv %s526_s20  ;;  %s932_s23 = sld [smem:[#allocation6 + $0x102]]  ;;  %s934_s28 = sld [smem:[#allocation6 + $0x103]] }
  0x5d   : > { %v247_v9 = vmul.f32 %v246_v6, %v242_v3  ;;  %v266_v12 = vstv %s528_s6  ;;  %v259_v15 = vmul.f32 %v258_v11, %v242_v3  ;;  %v295_v18 = vstv %s918_s7  ;;  %s1007_s15 = smov (!%p233_p5, %s737_s15), 1 }
  0x5e   : > { %v525_v14 = vrot.slane %v251_v10, 9  ;;  %v267_v16 = vmul.f32 %v266_v12, %v242_v3  ;;  %v297_v19 = vstv %s531_s9  ;;  %s551_s29 = sshll.u32 %s1007_s15, 3 }
  0x5f   : > { %v248_v13 = vadd.f32 %v247_v9, %v244_v5  ;;  %v527_v21 = vrot.slane %v259_v15, 10  ;;  %v298_v23 = vmul.f32 %v297_v19, %v242_v3  ;;  %v301_v24 = vstv %s922_s10  ;;  %s240_s27 = scalar_lea.vmem %s985_s3, %s551_s29 }
  0x60   : > { %v529_v22 = vrot.slane %v267_v16, 11  ;;  %v309_v25 = vstv %s924_s19  ;;  %v317_v26 = vstv %s536_s11  ;;  %v343_v27 = vstv %s926_s12 }
  0x61   : > { %v256_v20 = vadd.f32 %v525_v14, %v248_v13  ;;  %v299_v29 = vadd.f32 %v298_v23, %v295_v18  ;;  %v302_v30 = vmul.f32 %v301_v24, %v242_v3  ;;  %v310_v31 = vmul.f32 %v309_v25, %v242_v3 }
  0x62   : > { %v318_v32 = vmul.f32 %v317_v26, %v242_v3  ;;  %v345_v33 = vstv %s928_s18  ;;  %v349_v34 = vstv %s930_s22  ;;  %v357_v35 = vstv %s932_s23 }
  0x63   : > { %v264_v28 = vadd.f32 %v527_v21, %v256_v20  ;;  %v533_v37 = vrot.slane %v302_v30, 9  ;;  %v535_v38 = vrot.slane %v310_v31, 10  ;;  %v346_v39 = vmul.f32 %v345_v33, %v242_v3 }
  0x64   : > { %v537_v40 = vrot.slane %v318_v32, 11  ;;  %v350_v41 = vmul.f32 %v349_v34, %v242_v3  ;;  %v358_v42 = vmul.f32 %v357_v35, %v242_v3  ;;  %v365_v43 = vstv %s934_s28 }
  0x65   : > { %v272_v36 = vadd.f32 %v529_v22, %v264_v28  ;;  %v307_v45 = vadd.f32 %v533_v37, %v299_v29  ;;  %v347_v46 = vadd.f32 %v346_v39, %v343_v27  ;;  %v366_v47 = vmul.f32 %v365_v43, %v242_v3 }
  0x66   : > { %v542_v49 = vrot.slane %v350_v41, 9  ;;  %v544_v50 = vrot.slane %v358_v42, 10 }
  0x67   : > { %v280_v44 = vrot.slane %v272_v36, %v279_v17  ;;  %v315_v52 = vadd.f32 %v535_v38, %v307_v45  ;;  %v546_v54 = vrot.slane %v366_v47, 11 }
  0x68   : > { %v355_v53 = vadd.f32 %v542_v49, %v347_v46 }
  0x69   : > { %v287_v51 = vrot.slane %v280_v44, %v279_v17  ;;  %v323_v55 = vadd.f32 %v537_v40, %v315_v52 }
  0x6a   : > { %v363_v56 = vadd.f32 %v544_v50, %v355_v53 }
  0x6b   : > { %293 = vst.msk [vmem:[%s240_s27] ss:$4 sm:$0x3] %vm954_vm0, %v287_v51  ;;  %v331_v57 = vrot.slane %v323_v55, %v279_v17 }
  0x6c   : > { %v371_v58 = vadd.f32 %v546_v54, %v363_v56 }
  0x6d   : > { %v338_v59 = vrot.slane %v331_v57, %v279_v17 }
  0x6e   : > { %v379_v60 = vrot.slane %v371_v58, %v279_v17 }
  0x6f   : > { %538 = vst.msk [vmem:[%s240_s27 + $0x1] ss:$4 sm:$0x3] %vm954_vm0, %v338_v59 }
  0x70   : > { %v386_v61 = vrot.slane %v379_v60, %v279_v17 }
  0x72   : > { %547 = vst.msk [vmem:[%s240_s27 + $0x2] ss:$4 sm:$0x3] %vm954_vm0, %v386_v61 }
  0x73 PF: > { %s18_s17 = sadd.s32 1, %s745_s17   ;;  %s999_s12 = smov %s729_s13 }
  0x74   : > { %p15_p7 = scmp.ge.s32.totalorder %s18_s17, 4   ;;  %s1000_s13 = smov %s733_s14 }
  0x75   : > { %s1001_s14 = smov %s864_s25  ;;  %s1002_s15 = smov %s741_s16 }
  0x76   : > { %s1003_s16 = smov %s1005_s26  ;;  %17 = sbr.rel (!%p15_p7) target bundleno = 6 (0x6), region = 84 }
  0x7d   :  { %420 = vsyncpa [#allocation3], 1 }
  0x7e   :  { %422 = vsyncpa [#allocation3 + $0x1], 1 }
  0x7f   :  { %423 = vsyncpa [#allocation4], 1 }
  0x80   :  { %425 = vsyncpa [#allocation4 + $0x1], 1 }
  0x81   :  { %426 = vsyncpa [#allocation5], 1 }
  0x82   :  { %428 = vsyncpa [#allocation5 + $0x1], 1 }

</bundles_post_ra>
